<compile_context>
chip_gen: v7x
topology: tpu7x:2x2x1
jax: 0.10.0
libtpu: 0.0.40
codegen_flags: <defaults>
</compile_context>

<pallas_src>
import functools

import jax
import jax.numpy as jnp
from jax.experimental import pallas as pl
from jax.experimental.pallas import tpu as pltpu


def _round_up(n: int, m: int) -> int:
    return ((n + m - 1) // m) * m


def _cdiv(a: int, b: int) -> int:
    return -(-a // b)


def phinet_kernel(x_ref, w1_ref, b1_ref, w2_ref, b2_ref,
                  w3_ref, b3_ref, w4_ref, b4_ref, o_ref):
    cd = w1_ref.dtype
    # fc1 + ReLU (x cast to compute dtype in-kernel; f32 accumulate on the MXU)
    h = jnp.dot(x_ref[...].astype(cd), w1_ref[...],
                preferred_element_type=jnp.float32) + b1_ref[...]
    h = jnp.maximum(h, 0.0)
    # fc2 + ReLU
    h = jnp.dot(h.astype(cd), w2_ref[...],
                preferred_element_type=jnp.float32) + b2_ref[...]
    h = jnp.maximum(h, 0.0)
    # fc3 + ReLU
    h = jnp.dot(h.astype(cd), w3_ref[...],
                preferred_element_type=jnp.float32) + b3_ref[...]
    h = jnp.maximum(h, 0.0)
    # fc4 (augmented: trailing ones-column folded into w4/b4)
    y = jnp.dot(h.astype(cd), w4_ref[...],
                preferred_element_type=jnp.float32) + b4_ref[...]
    o_ref[...] = y.astype(o_ref.dtype)


@functools.partial(jax.jit, static_argnames=("compute_dtype", "block_b"))
def phinet_forward(x, params, *, compute_dtype=jnp.bfloat16, block_b=1024):
    """x: [B, D_in] (or [D_in] like the PyTorch module). Returns [B, D_out] (or [D_out])."""
    squeeze = x.ndim == 1
    if squeeze:
        x = x[None, :]

    w1, b1, w2, b2, w3, b3, w4, b4 = params
    B, d_in = x.shape
    L2, d_out_m1 = w4.shape
    d_out = d_out_m1 + 1                       # +1 for the trailing ones column

    # --- Fold the trailing ones column into an augmented fc4 (zero col + bias 1) ---
    w4a = jnp.concatenate(
        [w4.astype(jnp.float32), jnp.zeros((L2, 1), jnp.float32)], axis=1)
    b4a = jnp.concatenate(
        [b4.reshape(1, -1).astype(jnp.float32), jnp.ones((1, 1), jnp.float32)], axis=1)

    # --- Batch tiling: no pad; >=4 grid steps when B is large (v7x megacore).
    #     Trailing partial block is masked on store (computation is row-wise). ---
    tb = max(8, min(block_b, _round_up(_cdiv(B, 4), 8)))
    if tb >= B:
        tb = B                                  # single block == full batch dim (legal)
    grid = (_cdiv(B, tb),)

    # --- dtype: weights fed to the MXU in compute_dtype; biases stay f32 (VPU adds) ---
    cd = compute_dtype
    w1c, w2c, w3c, w4c = (w.astype(cd) for w in (w1, w2, w3, w4a))
    b1f, b2f, b3f = (b.reshape(1, -1).astype(jnp.float32) for b in (b1, b2, b3))
    b4f = b4a

    resident = lambda a: pl.BlockSpec(a.shape, lambda i: (0, 0))

    out = pl.pallas_call(
        phinet_kernel,
        out_shape=jax.ShapeDtypeStruct((B, d_out), jnp.float32),
        grid=grid,
        in_specs=[
            pl.BlockSpec((tb, d_in), lambda i: (i, 0)),   # x tile streams over batch (f32)
            resident(w1c), resident(b1f),
            resident(w2c), resident(b2f),
            resident(w3c), resident(b3f),
            resident(w4c), resident(b4f),
        ],
        out_specs=pl.BlockSpec((tb, d_out), lambda i: (i, 0)),
        compiler_params=pltpu.CompilerParams(
            dimension_semantics=("parallel",)),
    )(x, w1c, b1f, w2c, b2f, w3c, b3f, w4c, b4f)

    if squeeze:
        out = out[0]
    return out


def init_params(key, dim_in, dim_l0, dim_l1, dim_l2, dim_out):
    """Deterministic synthetic parameters. Weights stored as (in, out)."""
    ks = jax.random.split(key, 8)

    def lin(kw, kb, din, dout):
        w = (jax.random.normal(kw, (din, dout), jnp.float32) / jnp.sqrt(din)).astype(jnp.float32)
        b = jax.random.normal(kb, (1, dout), jnp.float32) * 0.01
        return w, b

    w1, b1 = lin(ks[0], ks[1], dim_in, dim_l0)
    w2, b2 = lin(ks[2], ks[3], dim_l0, dim_l1)
    w3, b3 = lin(ks[4], ks[5], dim_l1, dim_l2)
    w4, b4 = lin(ks[6], ks[7], dim_l2, dim_out - 1)
    return (w1, b1, w2, b2, w3, b3, w4, b4)


def ref_forward(x, params, compute_dtype=jnp.bfloat16):
    """Pure-JAX reference with the same bf16-operand / f32-accumulate math."""
    squeeze = x.ndim == 1
    if squeeze:
        x = x[None, :]
    w1, b1, w2, b2, w3, b3, w4, b4 = params
    cd = compute_dtype
    h = jnp.dot(x.astype(cd), w1.astype(cd), preferred_element_type=jnp.float32) + b1
    h = jnp.maximum(h, 0.0)
    h = jnp.dot(h.astype(cd), w2.astype(cd), preferred_element_type=jnp.float32) + b2
    h = jnp.maximum(h, 0.0)
    h = jnp.dot(h.astype(cd), w3.astype(cd), preferred_element_type=jnp.float32) + b3
    h = jnp.maximum(h, 0.0)
    y = jnp.dot(h.astype(cd), w4.astype(cd), preferred_element_type=jnp.float32) + b4
    out = jnp.concatenate([y, jnp.ones((y.shape[0], 1), jnp.float32)], axis=-1)
    return out[0] if squeeze else out


if __name__ == "__main__":
    # Config consistent with the module:
    # dim_of_input=32, dim_of_layer0=64, dim_of_layer1=64, dim_of_layer2=32, dim_of_output=16
    DIM_IN, L0, L1, L2, DIM_OUT = 32, 64, 64, 32, 16
    BATCH = 8

    key = jax.random.PRNGKey(0)
    kx, kp = jax.random.split(key)
    x = jax.random.normal(kx, (BATCH, DIM_IN), jnp.float32)
    params = init_params(kp, DIM_IN, L0, L1, L2, DIM_OUT)

    # Batched path
    out = jax.block_until_ready(phinet_forward(x, params))
    ref = ref_forward(x, params)
    assert out.shape == (BATCH, DIM_OUT), out.shape
    assert jnp.allclose(out, ref, atol=2e-3, rtol=2e-3), float(jnp.max(jnp.abs(out - ref)))
    # ones column is exact
    assert jnp.all(out[:, -1] == 1.0)

    # Non-multiple batch (exercises the masked trailing partial block, no pad)
    x13 = jax.random.normal(jax.random.PRNGKey(1), (13, DIM_IN), jnp.float32)
    out13 = jax.block_until_ready(phinet_forward(x13, params))
    ref13 = ref_forward(x13, params)
    assert out13.shape == (13, DIM_OUT), out13.shape
    assert jnp.allclose(out13, ref13, atol=2e-3, rtol=2e-3), float(jnp.max(jnp.abs(out13 - ref13)))
    assert jnp.all(out13[:, -1] == 1.0)

    # 1-D input path (mirrors the module's len(x.shape) == 1 branch)
    x1 = x[0]
    out1 = jax.block_until_ready(phinet_forward(x1, params))
    ref1 = ref_forward(x1, params)
    assert out1.shape == (DIM_OUT,), out1.shape
    assert jnp.allclose(out1, ref1, atol=2e-3, rtol=2e-3), float(jnp.max(jnp.abs(out1 - ref1)))
    assert out1[-1] == 1.0

    print("KERNEL_OK")
</pallas_src>

<mosaic_0001>
module attributes {stable_mosaic.version = 11 : i64} {
  func.func @phinet_kernel(%arg0: i32, %arg1: memref<8x32xf32, #tpu.memory_space<vmem>>, %arg2: memref<32x64xbf16, #tpu.memory_space<vmem>>, %arg3: memref<1x64xf32, #tpu.memory_space<vmem>>, %arg4: memref<64x64xbf16, #tpu.memory_space<vmem>>, %arg5: memref<1x64xf32, #tpu.memory_space<vmem>>, %arg6: memref<64x32xbf16, #tpu.memory_space<vmem>>, %arg7: memref<1x32xf32, #tpu.memory_space<vmem>>, %arg8: memref<32x16xbf16, #tpu.memory_space<vmem>>, %arg9: memref<1x16xf32, #tpu.memory_space<vmem>>, %arg10: memref<8x16xf32, #tpu.memory_space<vmem>>) attributes {dimension_semantics = [#tpu.dimension_semantics<parallel>], iteration_bounds = array<i64: 1>, scalar_prefetch = 0 : i64, scratch_operands = 0 : i64, tpu.core_type = #tpu.core_type<tc>, window_params = [{transform_indices = @transform_0, window_bounds = array<i64: 8, 32>}, {pipeline_mode = #tpu.pipeline_mode<synchronous>, transform_indices = @transform_1, window_bounds = array<i64: 32, 64>}, {pipeline_mode = #tpu.pipeline_mode<synchronous>, transform_indices = @transform_2, window_bounds = array<i64: 1, 64>}, {pipeline_mode = #tpu.pipeline_mode<synchronous>, transform_indices = @transform_3, window_bounds = array<i64: 64, 64>}, {pipeline_mode = #tpu.pipeline_mode<synchronous>, transform_indices = @transform_4, window_bounds = array<i64: 1, 64>}, {pipeline_mode = #tpu.pipeline_mode<synchronous>, transform_indices = @transform_5, window_bounds = array<i64: 64, 32>}, {pipeline_mode = #tpu.pipeline_mode<synchronous>, transform_indices = @transform_6, window_bounds = array<i64: 1, 32>}, {pipeline_mode = #tpu.pipeline_mode<synchronous>, transform_indices = @transform_7, window_bounds = array<i64: 32, 16>}, {pipeline_mode = #tpu.pipeline_mode<synchronous>, transform_indices = @transform_8, window_bounds = array<i64: 1, 16>}, {transform_indices = @transform_9, window_bounds = array<i64: 8, 16>}]} {
    %c0 = arith.constant 0 : index
    %c0_0 = arith.constant 0 : index
    %0 = vector.load %arg1[%c0, %c0_0] : memref<8x32xf32, #tpu.memory_space<vmem>>, vector<8x32xf32>
    %1 = arith.truncf %0 : vector<8x32xf32> to vector<8x32xbf16>
    %c0_1 = arith.constant 0 : index
    %c0_2 = arith.constant 0 : index
    %2 = vector.load %arg2[%c0_1, %c0_2] : memref<32x64xbf16, #tpu.memory_space<vmem>>, vector<32x64xbf16>
    %cst = arith.constant dense<0.000000e+00> : vector<8x64xf32>
    %3 = tpu.matmul %1, %2, %cst {dimension_numbers = #tpu.dot_dimension_numbers<[1], [0], [0], [1], [0, 0, 1, 1], [], []>} : vector<8x32xbf16>, vector<32x64xbf16>, vector<8x64xf32> -> vector<8x64xf32>
    %c0_3 = arith.constant 0 : index
    %c0_4 = arith.constant 0 : index
    %4 = vector.load %arg3[%c0_3, %c0_4] : memref<1x64xf32, #tpu.memory_space<vmem>>, vector<1x64xf32>
    %5 = vector.broadcast %4 : vector<1x64xf32> to vector<8x64xf32>
    %6 = arith.addf %3, %5 : vector<8x64xf32>
    %cst_5 = arith.constant 0.000000e+00 : f32
    %7 = vector.broadcast %cst_5 : f32 to vector<8x64xf32>
    %8 = arith.maximumf %6, %7 : vector<8x64xf32>
    %9 = arith.truncf %8 : vector<8x64xf32> to vector<8x64xbf16>
    %c0_6 = arith.constant 0 : index
    %c0_7 = arith.constant 0 : index
    %10 = vector.load %arg4[%c0_6, %c0_7] : memref<64x64xbf16, #tpu.memory_space<vmem>>, vector<64x64xbf16>
    %cst_8 = arith.constant dense<0.000000e+00> : vector<8x64xf32>
    %11 = tpu.matmul %9, %10, %cst_8 {dimension_numbers = #tpu.dot_dimension_numbers<[1], [0], [0], [1], [0, 0, 1, 1], [], []>} : vector<8x64xbf16>, vector<64x64xbf16>, vector<8x64xf32> -> vector<8x64xf32>
    %c0_9 = arith.constant 0 : index
    %c0_10 = arith.constant 0 : index
    %12 = vector.load %arg5[%c0_9, %c0_10] : memref<1x64xf32, #tpu.memory_space<vmem>>, vector<1x64xf32>
    %13 = vector.broadcast %12 : vector<1x64xf32> to vector<8x64xf32>
    %14 = arith.addf %11, %13 : vector<8x64xf32>
    %cst_11 = arith.constant 0.000000e+00 : f32
    %15 = vector.broadcast %cst_11 : f32 to vector<8x64xf32>
    %16 = arith.maximumf %14, %15 : vector<8x64xf32>
    %17 = arith.truncf %16 : vector<8x64xf32> to vector<8x64xbf16>
    %c0_12 = arith.constant 0 : index
    %c0_13 = arith.constant 0 : index
    %18 = vector.load %arg6[%c0_12, %c0_13] : memref<64x32xbf16, #tpu.memory_space<vmem>>, vector<64x32xbf16>
    %cst_14 = arith.constant dense<0.000000e+00> : vector<8x32xf32>
    %19 = tpu.matmul %17, %18, %cst_14 {dimension_numbers = #tpu.dot_dimension_numbers<[1], [0], [0], [1], [0, 0, 1, 1], [], []>} : vector<8x64xbf16>, vector<64x32xbf16>, vector<8x32xf32> -> vector<8x32xf32>
    %c0_15 = arith.constant 0 : index
    %c0_16 = arith.constant 0 : index
    %20 = vector.load %arg7[%c0_15, %c0_16] : memref<1x32xf32, #tpu.memory_space<vmem>>, vector<1x32xf32>
    %21 = vector.broadcast %20 : vector<1x32xf32> to vector<8x32xf32>
    %22 = arith.addf %19, %21 : vector<8x32xf32>
    %cst_17 = arith.constant 0.000000e+00 : f32
    %23 = vector.broadcast %cst_17 : f32 to vector<8x32xf32>
    %24 = arith.maximumf %22, %23 : vector<8x32xf32>
    %25 = arith.truncf %24 : vector<8x32xf32> to vector<8x32xbf16>
    %c0_18 = arith.constant 0 : index
    %c0_19 = arith.constant 0 : index
    %26 = vector.load %arg8[%c0_18, %c0_19] : memref<32x16xbf16, #tpu.memory_space<vmem>>, vector<32x16xbf16>
    %cst_20 = arith.constant dense<0.000000e+00> : vector<8x16xf32>
    %27 = tpu.matmul %25, %26, %cst_20 {dimension_numbers = #tpu.dot_dimension_numbers<[1], [0], [0], [1], [0, 0, 1, 1], [], []>} : vector<8x32xbf16>, vector<32x16xbf16>, vector<8x16xf32> -> vector<8x16xf32>
    %c0_21 = arith.constant 0 : index
    %c0_22 = arith.constant 0 : index
    %28 = vector.load %arg9[%c0_21, %c0_22] : memref<1x16xf32, #tpu.memory_space<vmem>>, vector<1x16xf32>
    %29 = vector.broadcast %28 : vector<1x16xf32> to vector<8x16xf32>
    %30 = arith.addf %27, %29 : vector<8x16xf32>
    %c0_23 = arith.constant 0 : index
    %c0_24 = arith.constant 0 : index
    %31 = vector.load %arg10[%c0_23, %c0_24] : memref<8x16xf32, #tpu.memory_space<vmem>>, vector<8x16xf32>
    tpu.vector_store %arg10[%c0_23, %c0_24], %30 {strides = array<i32>} : memref<8x16xf32, #tpu.memory_space<vmem>>, vector<8x16xf32>,
    return
  }
  func.func @transform_0(%arg0: i32) -> (i32, i32) {
    %c0_i32 = arith.constant 0 : i32
    %c0_i32_0 = arith.constant 0 : i32
    return %arg0, %c0_i32 : i32, i32
  }
  func.func @transform_1(%arg0: i32) -> (i32, i32) {
    %c0_i32 = arith.constant 0 : i32
    %c0_i32_0 = arith.constant 0 : i32
    %c0_i32_1 = arith.constant 0 : i32
    return %c0_i32, %c0_i32_0 : i32, i32
  }
  func.func @transform_2(%arg0: i32) -> (i32, i32) {
    %c0_i32 = arith.constant 0 : i32
    %c0_i32_0 = arith.constant 0 : i32
    %c0_i32_1 = arith.constant 0 : i32
    return %c0_i32, %c0_i32_0 : i32, i32
  }
  func.func @transform_3(%arg0: i32) -> (i32, i32) {
    %c0_i32 = arith.constant 0 : i32
    %c0_i32_0 = arith.constant 0 : i32
    %c0_i32_1 = arith.constant 0 : i32
    return %c0_i32, %c0_i32_0 : i32, i32
  }
  func.func @transform_4(%arg0: i32) -> (i32, i32) {
    %c0_i32 = arith.constant 0 : i32
    %c0_i32_0 = arith.constant 0 : i32
    %c0_i32_1 = arith.constant 0 : i32
    return %c0_i32, %c0_i32_0 : i32, i32
  }
  func.func @transform_5(%arg0: i32) -> (i32, i32) {
    %c0_i32 = arith.constant 0 : i32
    %c0_i32_0 = arith.constant 0 : i32
    %c0_i32_1 = arith.constant 0 : i32
    return %c0_i32, %c0_i32_0 : i32, i32
  }
  func.func @transform_6(%arg0: i32) -> (i32, i32) {
    %c0_i32 = arith.constant 0 : i32
    %c0_i32_0 = arith.constant 0 : i32
    %c0_i32_1 = arith.constant 0 : i32
    return %c0_i32, %c0_i32_0 : i32, i32
  }
  func.func @transform_7(%arg0: i32) -> (i32, i32) {
    %c0_i32 = arith.constant 0 : i32
    %c0_i32_0 = arith.constant 0 : i32
    %c0_i32_1 = arith.constant 0 : i32
    return %c0_i32, %c0_i32_0 : i32, i32
  }
  func.func @transform_8(%arg0: i32) -> (i32, i32) {
    %c0_i32 = arith.constant 0 : i32
    %c0_i32_0 = arith.constant 0 : i32
    %c0_i32_1 = arith.constant 0 : i32
    return %c0_i32, %c0_i32_0 : i32, i32
  }
  func.func @transform_9(%arg0: i32) -> (i32, i32) {
    %c0_i32 = arith.constant 0 : i32
    %c0_i32_0 = arith.constant 0 : i32
    return %arg0, %c0_i32 : i32, i32
  }
}

</mosaic_0001>

<bundles_post_ra>
// kernel: phinet_forward.1
= control target key start
LH: loop header
LB: loop body
LE: loop exit
PB: predicated region body
PF: predicated region fallthrough
CT: control target
= control target key end

     0   :  { %v471_v1 = vmov 0.0   ;;  %vm472_vm0 = vmmov 0   ;;  %vm59_vm1 = vcmask 261120   ;;  %s595_s0 = inlined_call_operand.vmem [shape: f32[8,32], index: 0, kind: input, shape index: {}]   ;;  %s596_s1 = inlined_call_operand.vmem [shape: bf16[32,64], index: 1, kind: input, shape index: {}]   ;;  %s597_s2 = inlined_call_operand.vmem [shape: f32[1,64], index: 2, kind: input, shape index: {}]   ;;  %s598_s3 = inlined_call_operand.vmem [shape: bf16[64,64], index: 3, kind: input, shape index: {}]   ;;  %s599_s4 = inlined_call_operand.vmem [shape: f32[1,64], index: 4, kind: input, shape index: {}]   ;;  %s600_s5 = inlined_call_operand.vmem [shape: bf16[64,32], index: 5, kind: input, shape index: {}]   ;;  %s601_s6 = inlined_call_operand.vmem [shape: f32[1,32], index: 6, kind: input, shape index: {}]   ;;  %s602_s7 = inlined_call_operand.vmem [shape: bf16[32,16], index: 7, kind: input, shape index: {}]   ;;  %s603_s8 = inlined_call_operand.vmem [shape: f32[1,16], index: 8, kind: input, shape index: {}]   ;;  %s604_s9 = inlined_call_operand.hbm [shape: f32[8,16], index: 9, kind: output, shape index: {}]  }
   0x1   :  { %v435_v0 = vld [vmem:[%s596_s1] sm:$0xff]   ;;  %392 = vmatprep.subr.bf16.mxu0 %v471_v1  ;;  %v436_v2 = vld [vmem:[%s596_s1 + $0x8] sm:$0xff]   ;;  %400 = vmatprep.subr.bf16.mxu1 %v471_v1 }
   0x2   :  { %393 = vmatpush3.bf16.msra.mxu0 %v435_v0  ;;  %396 = vmatprep.mubr.msk.bf16.mxu0 %vm472_vm0, %v471_v1  ;;  %v34_v3 = vld [vmem:[%s595_s0] sm:$0xff]  ;;  %v438_v5 = vld [vmem:[%s598_s3 + $0x8] sm:$0xff]  }
   0x3   :  { %394 = vmatprep.subr.bf16.mxu0 %v471_v1  ;;  %v437_v4 = vld [vmem:[%s598_s3] sm:$0xff]   ;;  %408 = vmatprep.mubr.msk.bf16.mxu1 %vm472_vm0, %v471_v1  ;;  %v35_v6 = vpack.c.bf16 %v34_v3, %v34_v3 }
   0x4   :  { %401 = vmatpush3.bf16.msra.mxu1 %v437_v4 }
   0x5   :  { %402 = vmatprep.subr.bf16.mxu1 %v471_v1 }
   0x6   :  { %395 = vmatpush3.bf16.msra.mxu0 %v436_v2 }
   0x7   :  { %412 = vmatprep.subr.bf16.mxu0 %v471_v1 }
   0x8   :  { %403 = vmatpush3.bf16.msra.mxu1 %v438_v5 }
   0x9   :  { %397 = vmatmul.mubr.msk.bf16.vlgmr.msra.gmra.mrb[0].mxu0 %vm59_vm1, %v35_v6  ;;  %404 = vmatprep.subr.bf16.mxu1 %v471_v1 }
   0xa   :  { %420 = vmatprep.mubr.msk.bf16.mxu0 %vm472_vm0, %v471_v1 }
   0xb   :  { %14 = vsyncpa [#allocation3], 0  ;;  %v439_v7 = vld [vmem:[%s598_s3 + $0x10] sm:$0xff]   ;;  %v440_v8 = vld [vmem:[%s598_s3 + $0x18] sm:$0xff]   ;;  %vm144_vm2 = vcmask 523264   ;;  %s473_s16 = smov [#allocation2]  }
   0xc   :  { %405 = vmatpush3.bf16.msra.mxu1 %v439_v7  ;;  %v441_v9 = vld [vmem:[%s600_s5] sm:$0xff]   ;;  %v442_v10 = vld [vmem:[%s600_s5 + $0x8] sm:$0xff]   ;;  %v443_v19 = vld [vmem:[%s600_s5 + $0x10] sm:$0xff]   ;;  %vm340_vm3 = vcmask 130048  }
   0xd   :  { %406 = vmatprep.subr.bf16.mxu1 %v471_v1  ;;  %413 = vmatpush3.bf16.msra.mxu0 %v441_v9  ;;  %v356_v11 = vld [vmem:[%s597_s2] ss:$0 sm:$0xff]  ;;  %v444_v20 = vld [vmem:[%s600_s5 + $0x18] sm:$0xff]   ;;  %v446_v30 = vld [vmem:[%s602_s7 + $0x8] sm:$0xff]  }
   0xe   :  { %414 = vmatprep.subr.bf16.mxu0 %v471_v1  ;;  %v445_v21 = vld [vmem:[%s602_s7] sm:$0xff]   ;;  %s348_s7 = sshll.u32 %s473_s16, 4  ;;  %s349_s7 = int_to_ptr.vmem [resolvable:$true] %s348_s7 }
   0xf   :  { %v360_v22 = vld [vmem:[%s599_s4] ss:$0 sm:$0xff]  ;;  %p452_p1 = scmp.lt.s32.totalorder %s349_s7, %s349_s7 }
  0x10   :  { %407 = vmatpush3.bf16.msra.mxu1 %v440_v8  ;;  %v366_v31 = vld [vmem:[%s601_s6] ss:$0 sm:$0xff]  ;;  %s447_s6 = scalar_lea.vmem %s349_s7, 128 }
  0x11   :  { %424 = vmatprep.subr.bf16.mxu1 %v471_v1  ;;  %415 = vmatpush3.bf16.msra.mxu0 %v442_v10  ;;  %v372_v39 = vld [vmem:[%s603_s8] ss:$0 sm:$0xff]  ;;  %p448_p0 = scmp.ne.s32.totalorder %s349_s7, %s447_s6  ;;  %p453_p2 = scmp.lt.s32.totalorder %s447_s6, %s447_s6 }
  0x12   :  { %416 = vmatprep.subr.bf16.mxu0 %v471_v1 }
  0x13   :  { %p454_p3 = por %p453_p2, %p452_p1 }
  0x15   :  { %417 = vmatpush3.bf16.msra.mxu0 %v443_v19  ;;  %p455_p4 = pnand %p454_p3, %p448_p0 }
  0x16   :  { %418 = vmatprep.subr.bf16.mxu0 %v471_v1 }
  0x19   :  { %419 = vmatpush3.bf16.msra.mxu0 %v444_v20 }
  0xdc   :  { %v97_v12 = vpop.f32.mrb[0].mxu0 }
  0xdd   :  { %v98_v13 = vadd.f32 %v356_v11, %v97_v12  ;;  %v398_v14 = vpop.f32.mrb[1].mxu0 }
  0xde   :  { %v100_v15 = vpop.f32.mrb[2].mxu0 }
  0xdf   :  { %v103_v16 = vmax.f32 %v98_v13, 0.0  ;;  %v399_v17 = vpop.f32.mrb[3].mxu0 }
  0xe1   :  { %v104_v18 = vpack.c.bf16 %v103_v16, %v103_v16 }
  0xe3   :  { %409 = vmatmul.mubr.msk.bf16.vlgmr.msra.gmra.mrb[0].mxu1 %vm144_vm2, %v104_v18 }
  0xe4   :  { %428 = vmatprep.mubr.msk.bf16.mxu1 %vm472_vm0, %v471_v1  ;;  %425 = vmatpush3.bf16.msra.mxu1 %v445_v21 }
  0xe5   :  { %426 = vmatprep.subr.bf16.mxu1 %v471_v1 }
  0xe8   :  { %427 = vmatpush3.bf16.msra.mxu1 %v446_v30 }
 0x1b6   :  { %v182_v23 = vpop.f32.mrb[0].mxu1 }
 0x1b7   :  { %v183_v24 = vadd.f32 %v360_v22, %v182_v23  ;;  %v410_v25 = vpop.f32.mrb[1].mxu1 }
 0x1b8   :  { %v185_v26 = vpop.f32.mrb[2].mxu1 }
 0x1b9   :  { %v188_v27 = vmax.f32 %v183_v24, 0.0  ;;  %v411_v28 = vpop.f32.mrb[3].mxu1 }
 0x1bb   :  { %v189_v29 = vpack.c.bf16 %v188_v27, %v188_v27 }
 0x1bd   :  { %421 = vmatmul.mubr.msk.bf16.vlgmr.msra.gmra.mrb[4].mxu0 %vm144_vm2, %v189_v29 }
 0x290   :  { %v266_v32 = vpop.f32.mrb[4].mxu0 }
 0x291   :  { %v267_v33 = vadd.f32 %v366_v31, %v266_v32  ;;  %v422_v34 = vpop.f32.mrb[5].mxu0 }
 0x292   :  { %v269_v35 = vpop.f32.mrb[6].mxu0 }
 0x293   :  { %v272_v36 = vmax.f32 %v267_v33, 0.0  ;;  %v423_v37 = vpop.f32.mrb[7].mxu0 }
 0x295   :  { %v273_v38 = vpack.c.bf16 %v272_v36, %v272_v36 }
 0x297   :  { %429 = vmatmul.mubr.msk.bf16.vlgmr.msra.gmra.mrb[4].mxu1 %vm59_vm1, %v273_v38 }
 0x36a   :  { %v334_v40 = vpop.f32.mrb[4].mxu1 }
 0x36b   :  { %v335_v41 = vadd.f32 %v372_v39, %v334_v40  ;;  %v430_v42 = vpop.f32.mrb[5].mxu1 }
 0x36c   :  { %v337_v43 = vpop.f32.mrb[6].mxu1 }
 0x36d   :  { %v431_v44 = vpop.f32.mrb[7].mxu1  ;;  %341 = vst.msk [vmem:[#allocation2] sm:$0xff] %vm340_vm3, %v335_v41 }
 0x36e   :  { %458 = shalt.err (!%p455_p4)
}
 0x36f   :  { %s459_s8 = scalar_lea.hbm %s604_s9, 128 }
 0x370   :  { %p460_p5 = scmp.ne.s32.totalorder %s604_s9, %s459_s8  ;;  %p463_p6 = scmp.lt.u32.totalorder %s459_s8, %s604_s9 }
 0x372   :  { %p465_p7 = pnand %p463_p6, %p460_p5 }
 0x374   :  { %468 = shalt.err (!%p465_p7)
}
 0x375   :  { %351 = dma.vmem_to_hbm [thread:$0]  %s349_s7, 128, %s604_s9, [#allocation3]  }
 0x376   :  { %469 = dma.done.wait [#allocation3], 128  }
 0x377   :  { %470 = vsyncadd [#allocation3], 4294967168 }
 0x378   :  { %355 = vsyncpa [#allocation3], 1 }

</bundles_post_ra>
